<compile_context>
chip_gen: v7x
topology: tpu7x:2x2x1
jax: 0.10.0
libtpu: 0.0.40
codegen_flags: <defaults>
</compile_context>

<pallas_src>
import math

import jax
import jax.numpy as jnp
from jax import lax
from jax.experimental import pallas as pl
from jax.experimental.pallas import tpu as pltpu


# ----------------------------------------------------------------------------
# tiling helpers (all picks are divisors -> no tail blocks, no padding passes)
# ----------------------------------------------------------------------------
def _pick_row_block(M, C, target=2048, block_budget_bytes=8 * 1024 * 1024):
    """Largest divisor of M that is a multiple of 8, <= target, fits the VMEM
    budget, and (when possible) leaves >= 2 grid blocks for megacore."""
    cap = min(target, M)
    cap = min(cap, max(8, (block_budget_bytes // (C * 2)) // 8 * 8))
    if M > 8:
        cap = min(cap, max(8, (M // 2) // 8 * 8))   # >= 2 blocks when possible
    for d in range(cap - cap % 8, 7, -8):
        if M % d == 0:
            return d
    return M  # fallback: single full-size block (block == full dim is legal)


def _pick_batch_block(B, bb_max=8):
    """Divisor of B, <= bb_max, and <= B//2 when B >= 2 (megacore sharding)."""
    cap = max(1, min(bb_max, B // 2))
    for d in range(cap, 0, -1):
        if B % d == 0:
            return d
    return 1


def _pick_seq_block(HW, target):
    """HW tile: full dim, or a divisor that is a multiple of 128 (the qpos tile
    has thw on the lane axis, the mem tile has it on the sublane axis)."""
    if HW <= target:
        return HW
    start = (min(target, HW) // 128) * 128
    for d in range(start, 127, -128):
        if HW % d == 0:
            return d
    # TODO(synk): no 128-multiple divisor <= target; single full-HW block
    # (only matters for awkwardly factored, very large feature maps).
    return HW


# ----------------------------------------------------------------------------
# Kernel 1: 1x1 conv as a tiled matmul over flattened spatial positions.
#   x_flat: (M, C) bf16   w: (C, D) bf16   b: (1, D) f32  ->  o: (M, D) bf16
# ----------------------------------------------------------------------------
def _proj_kernel(x_ref, w_ref, b_ref, o_ref):
    acc = jnp.dot(x_ref[...], w_ref[...], preferred_element_type=jnp.float32)
    o_ref[...] = (acc + b_ref[...]).astype(o_ref.dtype)


def conv1x1_proj(x_flat, w, b, *, tm_target=2048):
    M, C = x_flat.shape
    _, D = w.shape
    tm = _pick_row_block(M, C, tm_target)
    return pl.pallas_call(
        _proj_kernel,
        out_shape=jax.ShapeDtypeStruct((M, D), jnp.bfloat16),
        grid_spec=pltpu.PrefetchScalarGridSpec(
            num_scalar_prefetch=0,
            grid=(M // tm,),
            in_specs=[
                pl.BlockSpec((tm, C), lambda i: (i, 0)),
                pl.BlockSpec((C, D), lambda i: (0, 0)),   # weight stays resident
                pl.BlockSpec((1, D), lambda i: (0, 0)),
            ],
            out_specs=pl.BlockSpec((tm, D), lambda i: (i, 0)),
        ),
        compiler_params=pltpu.CompilerParams(
            dimension_semantics=("parallel",),
            vmem_limit_bytes=32 * 1024 * 1024),
    )(x_flat, w, b)


# ----------------------------------------------------------------------------
# Kernel 2: stand-in decoder cross-attention + fused GroupWiseLinear epilogue.
#   q     : (K, D)  bf16, pre-scaled by 1/sqrt(D), shared across batch
#   memory: (B, HW, D) bf16 -- DMA'd once per step, used as both K and V
#   qpos  : (K, HW) f32  = (query_w/sqrt(D)) @ pos^T, tiled over HW
#   fc_w  : (K, D) f32, fc_b: (1, K) f32
#   -> logits (B, K) f32
# Grid: (batch blocks [parallel], HW tiles [arbitrary], flash online softmax).
# ----------------------------------------------------------------------------
def _attn_gwl_kernel(q_ref, mem_ref, qpos_ref, fcw_ref, fcb_ref, o_ref,
                     m_sc, l_sc, acc_sc):
    t = pl.program_id(1)

    @pl.when(t == 0)
    def _():
        m_sc[...] = jnp.full_like(m_sc, -jnp.inf)
        l_sc[...] = jnp.zeros_like(l_sc)
        acc_sc[...] = jnp.zeros_like(acc_sc)

    bb = mem_ref.shape[0]
    q = q_ref[...]                       # (K, D) bf16, scale already folded in
    qpos = qpos_ref[...]                 # (K, thw) f32, scale already folded in

    # Short unrolled loop over the packed batch; q is shared (no broadcast_to),
    # every operand stays in a dense (sublane=K / lane=thw|D) 2D layout and the
    # score contracts on the last dim of BOTH operands (no XLU transpose).
    for b in range(bb):
        mem_b = mem_ref[b]                                       # (thw, D) bf16
        s = lax.dot_general(
            q, mem_b, (((1,), (1,)), ((), ())),
            preferred_element_type=jnp.float32) + qpos           # (K, thw) f32

        # online softmax, f32 math (v5e has no bf16 VPU/EUP path)
        m_prev = m_sc[b]                                         # (K, 1)
        m_new = jnp.maximum(m_prev, s.max(axis=-1, keepdims=True))
        alpha = jnp.exp(m_prev - m_new)
        p = jnp.exp(s - m_new)                                   # (K, thw) f32
        l_sc[b] = alpha * l_sc[b] + p.sum(axis=-1, keepdims=True)
        acc_sc[b] = alpha * acc_sc[b] + jnp.dot(
            p.astype(jnp.bfloat16), mem_b,
            preferred_element_type=jnp.float32)                  # (K, D) f32
        m_sc[b] = m_new

    @pl.when(t == pl.num_programs(1) - 1)
    def _():
        # exact reciprocal in the (once-per-batch-block) epilogue
        hs = acc_sc[...] * (1.0 / l_sc[...])                     # (bb, K, D) f32
        # fused GroupWiseLinear: out[b,c] = sum_d W[c,d]*hs[b,c,d] + b[c]
        logits = jnp.sum(hs * fcw_ref[...][None], axis=-1) + fcb_ref[...]
        o_ref[...] = logits[:, None, :].astype(o_ref.dtype)      # (bb, 1, K)


def attention_gwl(q_scaled, memory, qpos, fc_w, fc_b, *,
                  bb_max=8, thw_max=2048, mem_block_budget=8 * 1024 * 1024):
    B, HW, D = memory.shape
    K = q_scaled.shape[0]
    bb = _pick_batch_block(B, bb_max)
    # keep the double-buffered (bb, thw, D) bf16 block within the per-buffer
    # budget (generation-safe: v7x has 64 MiB VMEM vs 128 MiB on v5e/v6e)
    thw_cap = max(128, mem_block_budget // (bb * D * 2))
    thw = _pick_seq_block(HW, min(thw_max, thw_cap))
    grid = (B // bb, HW // thw)

    out = pl.pallas_call(
        _attn_gwl_kernel,
        out_shape=jax.ShapeDtypeStruct((B, 1, K), jnp.float32),
        grid_spec=pltpu.PrefetchScalarGridSpec(
            num_scalar_prefetch=0,
            grid=grid,
            in_specs=[
                pl.BlockSpec((K, D), lambda b, t: (0, 0)),           # q (resident)
                pl.BlockSpec((bb, thw, D), lambda b, t: (b, t, 0)),  # mem: K and V
                pl.BlockSpec((K, thw), lambda b, t: (0, t)),         # q·posᵀ tile
                pl.BlockSpec((K, D), lambda b, t: (0, 0)),           # fc W (resident)
                pl.BlockSpec((1, K), lambda b, t: (0, 0)),           # fc b (resident)
            ],
            out_specs=pl.BlockSpec((bb, 1, K), lambda b, t: (b, 0, 0)),
            scratch_shapes=[
                pltpu.VMEM((bb, K, 1), jnp.float32),   # running max
                pltpu.VMEM((bb, K, 1), jnp.float32),   # running denominator
                pltpu.VMEM((bb, K, D), jnp.float32),   # running numerator
            ],
        ),
        compiler_params=pltpu.CompilerParams(
            dimension_semantics=("parallel", "arbitrary"),
            vmem_limit_bytes=32 * 1024 * 1024),
    )(q_scaled, memory, qpos, fc_w, fc_b)
    return out.reshape(B, K)


# ----------------------------------------------------------------------------
# Parameters & positional encoding
# ----------------------------------------------------------------------------
def make_params(key, num_channels, hidden_dim, num_class):
    k1, k2, k3, k4, k5 = jax.random.split(key, 5)
    bound = 1.0 / math.sqrt(num_channels)
    proj_w = jax.random.uniform(k1, (hidden_dim, num_channels), jnp.float32, -bound, bound)
    proj_b = jax.random.uniform(k2, (hidden_dim,), jnp.float32, -bound, bound)
    query_w = jax.random.normal(k3, (num_class, hidden_dim), jnp.float32)
    stdv = 1.0 / math.sqrt(hidden_dim)
    fc_w = jax.random.uniform(k4, (1, num_class, hidden_dim), jnp.float32, -stdv, stdv)
    fc_b = jax.random.uniform(k5, (1, num_class), jnp.float32, -stdv, stdv)
    return dict(proj_w=proj_w, proj_b=proj_b, query_w=query_w, fc_w=fc_w, fc_b=fc_b)


def sine_pos_encoding(HW, D):
    # deterministic stand-in positional encoding, (HW, D) f32 (batch-invariant)
    n = jnp.arange(HW, dtype=jnp.float32)[:, None]
    d = jnp.arange(D, dtype=jnp.float32)[None, :]
    return jnp.sin(n / jnp.power(10000.0, d / D))


# ----------------------------------------------------------------------------
# Full forward: Qeruy2Label.forward
# ----------------------------------------------------------------------------
@jax.jit
def qeruy2label_forward(params, x_nchw):
    # TODO(synk): the real `backbone` is an injected external module; stand-in
    # treats the input feature map as the last backbone feature `src`.
    B, C, H, W = x_nchw.shape
    D = params["proj_w"].shape[0]
    HW = H * W
    scale = 1.0 / math.sqrt(D)

    # fused NCHW -> channels-last + bf16 cast (one pass over the feature map)
    x_flat = (jnp.transpose(x_nchw, (0, 2, 3, 1))
              .astype(jnp.bfloat16)
              .reshape(B * HW, C))

    # input_proj: 1x1 conv == per-pixel channel matmul (Pallas kernel 1, bf16)
    memory = conv1x1_proj(
        x_flat, params["proj_w"].T.astype(jnp.bfloat16), params["proj_b"][None, :]
    ).reshape(B, HW, D)                                           # (B, HW, D) bf16

    # TODO(synk): the real `transformer` is an injected external module; stand-in
    # is one cross-attention decoder step with GroupWiseLinear fused in-kernel.
    # fold 1/sqrt(D) into q once; distribute pos into a precomputed q·posᵀ term.
    pos = sine_pos_encoding(HW, D)                                # (HW, D) f32
    q_scaled = params["query_w"] * scale                          # (K, D) f32
    qpos = q_scaled @ pos.T                                       # (K, HW) f32

    out = attention_gwl(q_scaled.astype(jnp.bfloat16), memory, qpos,
                        params["fc_w"][0], params["fc_b"])        # (B, K) f32
    return out


if __name__ == "__main__":
    key = jax.random.PRNGKey(0)
    B, C, H, W = 2, 4, 16, 16        # batch, backbone.num_channels, spatial
    D, K = 32, 8                     # transformer.d_model, num_class

    kp, kx = jax.random.split(key)
    params = make_params(kp, num_channels=C, hidden_dim=D, num_class=K)
    x = jax.random.normal(kx, (B, C, H, W), jnp.float32)

    out = qeruy2label_forward(params, x)
    jax.block_until_ready(out)
    assert out.shape == (B, K), out.shape

    # f32 reference of the Pallas path; kernels use bf16 matmul operands, so
    # compare with a loose-but-meaningful tolerance.
    x_flat = jnp.transpose(x, (0, 2, 3, 1)).reshape(B * H * W, C)
    mem_ref = (x_flat @ params["proj_w"].T + params["proj_b"]).reshape(B, H * W, D)
    pos_ref = sine_pos_encoding(H * W, D)
    s = jnp.einsum("kd,bnd->bkn", params["query_w"], mem_ref + pos_ref[None]) / math.sqrt(D)
    p = jax.nn.softmax(s, axis=-1)
    hs_ref = jnp.einsum("bkn,bnd->bkd", p, mem_ref)
    out_ref = (params["fc_w"] * hs_ref).sum(-1) + params["fc_b"]
    err = float(jnp.max(jnp.abs(out - out_ref)))
    assert jnp.allclose(out, out_ref, atol=3e-2, rtol=3e-2), err

    print("KERNEL_OK")
</pallas_src>

<mosaic_0001>
module attributes {stable_mosaic.version = 11 : i64} {
  func.func @_proj_kernel(%arg0: i32, %arg1: memref<256x4xbf16, #tpu.memory_space<vmem>>, %arg2: memref<4x32xbf16, #tpu.memory_space<vmem>>, %arg3: memref<1x32xf32, #tpu.memory_space<vmem>>, %arg4: memref<256x32xbf16, #tpu.memory_space<vmem>>) attributes {dimension_semantics = [#tpu.dimension_semantics<parallel>], iteration_bounds = array<i64: 2>, scalar_prefetch = 0 : i64, scratch_operands = 0 : i64, tpu.core_type = #tpu.core_type<tc>, window_params = [{transform_indices = @transform_0, window_bounds = array<i64: 256, 4>}, {pipeline_mode = #tpu.pipeline_mode<synchronous>, transform_indices = @transform_1, window_bounds = array<i64: 4, 32>}, {pipeline_mode = #tpu.pipeline_mode<synchronous>, transform_indices = @transform_2, window_bounds = array<i64: 1, 32>}, {transform_indices = @transform_3, window_bounds = array<i64: 256, 32>}]} {
    %c0 = arith.constant 0 : index
    %c0_0 = arith.constant 0 : index
    %0 = vector.load %arg1[%c0, %c0_0] : memref<256x4xbf16, #tpu.memory_space<vmem>>, vector<256x4xbf16>
    %c0_1 = arith.constant 0 : index
    %c0_2 = arith.constant 0 : index
    %1 = vector.load %arg2[%c0_1, %c0_2] : memref<4x32xbf16, #tpu.memory_space<vmem>>, vector<4x32xbf16>
    %cst = arith.constant dense<0.000000e+00> : vector<256x32xf32>
    %2 = tpu.matmul %0, %1, %cst {dimension_numbers = #tpu.dot_dimension_numbers<[1], [0], [0], [1], [0, 0, 1, 1], [], []>} : vector<256x4xbf16>, vector<4x32xbf16>, vector<256x32xf32> -> vector<256x32xf32>
    %c0_3 = arith.constant 0 : index
    %c0_4 = arith.constant 0 : index
    %3 = vector.load %arg3[%c0_3, %c0_4] : memref<1x32xf32, #tpu.memory_space<vmem>>, vector<1x32xf32>
    %4 = vector.broadcast %3 : vector<1x32xf32> to vector<256x32xf32>
    %5 = arith.addf %2, %4 : vector<256x32xf32>
    %6 = arith.truncf %5 : vector<256x32xf32> to vector<256x32xbf16>
    %c0_5 = arith.constant 0 : index
    %c0_6 = arith.constant 0 : index
    %7 = vector.load %arg4[%c0_5, %c0_6] : memref<256x32xbf16, #tpu.memory_space<vmem>>, vector<256x32xbf16>
    tpu.vector_store %arg4[%c0_5, %c0_6], %6 {strides = array<i32>} : memref<256x32xbf16, #tpu.memory_space<vmem>>, vector<256x32xbf16>,
    return
  }
  func.func @transform_0(%arg0: i32) -> (i32, i32) {
    %c0_i32 = arith.constant 0 : i32
    %c0_i32_0 = arith.constant 0 : i32
    return %arg0, %c0_i32 : i32, i32
  }
  func.func @transform_1(%arg0: i32) -> (i32, i32) {
    %c0_i32 = arith.constant 0 : i32
    %c0_i32_0 = arith.constant 0 : i32
    %c0_i32_1 = arith.constant 0 : i32
    return %c0_i32, %c0_i32_0 : i32, i32
  }
  func.func @transform_2(%arg0: i32) -> (i32, i32) {
    %c0_i32 = arith.constant 0 : i32
    %c0_i32_0 = arith.constant 0 : i32
    %c0_i32_1 = arith.constant 0 : i32
    return %c0_i32, %c0_i32_0 : i32, i32
  }
  func.func @transform_3(%arg0: i32) -> (i32, i32) {
    %c0_i32 = arith.constant 0 : i32
    %c0_i32_0 = arith.constant 0 : i32
    return %arg0, %c0_i32 : i32, i32
  }
}

module attributes {stable_mosaic.version = 11 : i64} {
  func.func @_attn_gwl_kernel(%arg0: i32, %arg1: i32, %arg2: memref<8x32xbf16, #tpu.memory_space<vmem>>, %arg3: memref<1x256x32xbf16, #tpu.memory_space<vmem>>, %arg4: memref<8x256xf32, #tpu.memory_space<vmem>>, %arg5: memref<8x32xf32, #tpu.memory_space<vmem>>, %arg6: memref<1x8xf32, #tpu.memory_space<vmem>>, %arg7: memref<1x1x8xf32, #tpu.memory_space<vmem>>, %arg8: memref<1x8x1xf32, #tpu.memory_space<vmem>>, %arg9: memref<1x8x1xf32, #tpu.memory_space<vmem>>, %arg10: memref<1x8x32xf32, #tpu.memory_space<vmem>>) attributes {dimension_semantics = [#tpu.dimension_semantics<parallel>, #tpu.dimension_semantics<arbitrary>], iteration_bounds = array<i64: 2, 1>, scalar_prefetch = 0 : i64, scratch_operands = 3 : i64, tpu.core_type = #tpu.core_type<tc>, window_params = [{pipeline_mode = #tpu.pipeline_mode<synchronous>, transform_indices = @transform_0, window_bounds = array<i64: 8, 32>}, {transform_indices = @transform_1, window_bounds = array<i64: 1, 256, 32>}, {transform_indices = @transform_2, window_bounds = array<i64: 8, 256>}, {pipeline_mode = #tpu.pipeline_mode<synchronous>, transform_indices = @transform_3, window_bounds = array<i64: 8, 32>}, {pipeline_mode = #tpu.pipeline_mode<synchronous>, transform_indices = @transform_4, window_bounds = array<i64: 1, 8>}, {transform_indices = @transform_5, window_bounds = array<i64: 1, 1, 8>}]} {
    %c0_i32 = arith.constant 0 : i32
    %0 = arith.cmpi eq, %arg1, %c0_i32 : i32
    %1 = arith.extui %0 : i1 to i32
    %c0_i32_0 = arith.constant 0 : i32
    %2 = arith.cmpi ne, %1, %c0_i32_0 : i32
    scf.if %2 {
      %cst_30 = arith.constant 0xFF800000 : f32
      %44 = vector.broadcast %cst_30 : f32 to vector<1x8x1xf32>
      %c0_31 = arith.constant 0 : index
      %c0_32 = arith.constant 0 : index
      %c0_33 = arith.constant 0 : index
      %45 = vector.load %arg8[%c0_31, %c0_32, %c0_33] : memref<1x8x1xf32, #tpu.memory_space<vmem>>, vector<1x8x1xf32>
      tpu.vector_store %arg8[%c0_31, %c0_32, %c0_33], %44 {strides = array<i32>} : memref<1x8x1xf32, #tpu.memory_space<vmem>>, vector<1x8x1xf32>,
      %cst_34 = arith.constant 0.000000e+00 : f32
      %46 = vector.broadcast %cst_34 : f32 to vector<1x8x1xf32>
      %c0_35 = arith.constant 0 : index
      %c0_36 = arith.constant 0 : index
      %c0_37 = arith.constant 0 : index
      %47 = vector.load %arg9[%c0_35, %c0_36, %c0_37] : memref<1x8x1xf32, #tpu.memory_space<vmem>>, vector<1x8x1xf32>
      tpu.vector_store %arg9[%c0_35, %c0_36, %c0_37], %46 {strides = array<i32>} : memref<1x8x1xf32, #tpu.memory_space<vmem>>, vector<1x8x1xf32>,
      %cst_38 = arith.constant 0.000000e+00 : f32
      %48 = vector.broadcast %cst_38 : f32 to vector<1x8x32xf32>
      %c0_39 = arith.constant 0 : index
      %c0_40 = arith.constant 0 : index
      %c0_41 = arith.constant 0 : index
      %49 = vector.load %arg10[%c0_39, %c0_40, %c0_41] : memref<1x8x32xf32, #tpu.memory_space<vmem>>, vector<1x8x32xf32>
      tpu.vector_store %arg10[%c0_39, %c0_40, %c0_41], %48 {strides = array<i32>} : memref<1x8x32xf32, #tpu.memory_space<vmem>>, vector<1x8x32xf32>,
    } else {
    }
    %c0 = arith.constant 0 : index
    %c0_1 = arith.constant 0 : index
    %3 = vector.load %arg2[%c0, %c0_1] : memref<8x32xbf16, #tpu.memory_space<vmem>>, vector<8x32xbf16>
    %c0_2 = arith.constant 0 : index
    %c0_3 = arith.constant 0 : index
    %4 = vector.load %arg4[%c0_2, %c0_3] : memref<8x256xf32, #tpu.memory_space<vmem>>, vector<8x256xf32>
    %c0_4 = arith.constant 0 : index
    %c0_5 = arith.constant 0 : index
    %c0_6 = arith.constant 0 : index
    %5 = vector.load %arg3[%c0_4, %c0_5, %c0_6] : memref<1x256x32xbf16, #tpu.memory_space<vmem>>, vector<1x256x32xbf16>
    %6 = vector.shape_cast %5 : vector<1x256x32xbf16> to vector<256x32xbf16>
    %cst = arith.constant dense<0.000000e+00> : vector<8x256xf32>
    %7 = tpu.matmul %3, %6, %cst {dimension_numbers = #tpu.dot_dimension_numbers<[1], [1], [0], [0], [0, 0, 1, 0], [], []>} : vector<8x32xbf16>, vector<256x32xbf16>, vector<8x256xf32> -> vector<8x256xf32>
    %8 = arith.addf %7, %4 : vector<8x256xf32>
    %c0_7 = arith.constant 0 : index
    %c0_8 = arith.constant 0 : index
    %c0_9 = arith.constant 0 : index
    %9 = vector.load %arg8[%c0_7, %c0_8, %c0_9] : memref<1x8x1xf32, #tpu.memory_space<vmem>>, vector<1x8x1xf32>
    %10 = vector.shape_cast %9 : vector<1x8x1xf32> to vector<8x1xf32>
    %cst_10 = arith.constant dense<0xFF800000> : vector<8xf32>
    %11 = vector.multi_reduction <maximumf>, %8, %cst_10 [1] : vector<8x256xf32> to vector<8xf32>
    %12 = vector.shape_cast %11 : vector<8xf32> to vector<8x1xf32>
    %13 = arith.maximumf %10, %12 : vector<8x1xf32>
    %14 = arith.subf %10, %13 : vector<8x1xf32>
    %15 = math.exp %14 : vector<8x1xf32>
    %16 = vector.broadcast %13 : vector<8x1xf32> to vector<8x256xf32>
    %17 = arith.subf %8, %16 : vector<8x256xf32>
    %18 = math.exp %17 : vector<8x256xf32>
    %c0_11 = arith.constant 0 : index
    %c0_12 = arith.constant 0 : index
    %c0_13 = arith.constant 0 : index
    %19 = vector.load %arg9[%c0_11, %c0_12, %c0_13] : memref<1x8x1xf32, #tpu.memory_space<vmem>>, vector<1x8x1xf32>
    %20 = vector.shape_cast %19 : vector<1x8x1xf32> to vector<8x1xf32>
    %21 = arith.mulf %15, %20 : vector<8x1xf32>
    %cst_14 = arith.constant dense<0.000000e+00> : vector<8xf32>
    %22 = vector.multi_reduction <add>, %18, %cst_14 [1] : vector<8x256xf32> to vector<8xf32>
    %23 = vector.shape_cast %22 : vector<8xf32> to vector<8x1xf32>
    %24 = arith.addf %21, %23 : vector<8x1xf32>
    %c0_15 = arith.constant 0 : index
    %c0_16 = arith.constant 0 : index
    %c0_17 = arith.constant 0 : index
    %25 = vector.load %arg9[%c0_15, %c0_16, %c0_17] : memref<1x8x1xf32, #tpu.memory_space<vmem>>, vector<1x8x1xf32>
    %26 = vector.shape_cast %25 : vector<1x8x1xf32> to vector<8x1xf32>
    %27 = vector.shape_cast %24 : vector<8x1xf32> to vector<1x8x1xf32>
    tpu.vector_store %arg9[%c0_15, %c0_16, %c0_17], %27 {strides = array<i32>} : memref<1x8x1xf32, #tpu.memory_space<vmem>>, vector<1x8x1xf32>,
    %c0_18 = arith.constant 0 : index
    %c0_19 = arith.constant 0 : index
    %c0_20 = arith.constant 0 : index
    %28 = vector.load %arg10[%c0_18, %c0_19, %c0_20] : memref<1x8x32xf32, #tpu.memory_space<vmem>>, vector<1x8x32xf32>
    %29 = vector.shape_cast %28 : vector<1x8x32xf32> to vector<8x32xf32>
    %30 = vector.broadcast %15 : vector<8x1xf32> to vector<8x32xf32>
    %31 = arith.mulf %30, %29 : vector<8x32xf32>
    %32 = arith.truncf %18 : vector<8x256xf32> to vector<8x256xbf16>
    %cst_21 = arith.constant dense<0.000000e+00> : vector<8x32xf32>
    %33 = tpu.matmul %32, %6, %cst_21 {dimension_numbers = #tpu.dot_dimension_numbers<[1], [0], [0], [1], [0, 0, 1, 1], [], []>} : vector<8x256xbf16>, vector<256x32xbf16>, vector<8x32xf32> -> vector<8x32xf32>
    %34 = arith.addf %31, %33 : vector<8x32xf32>
    %c0_22 = arith.constant 0 : index
    %c0_23 = arith.constant 0 : index
    %c0_24 = arith.constant 0 : index
    %35 = vector.load %arg10[%c0_22, %c0_23, %c0_24] : memref<1x8x32xf32, #tpu.memory_space<vmem>>, vector<1x8x32xf32>
    %36 = vector.shape_cast %35 : vector<1x8x32xf32> to vector<8x32xf32>
    %37 = vector.shape_cast %34 : vector<8x32xf32> to vector<1x8x32xf32>
    tpu.vector_store %arg10[%c0_22, %c0_23, %c0_24], %37 {strides = array<i32>} : memref<1x8x32xf32, #tpu.memory_space<vmem>>, vector<1x8x32xf32>,
    %c0_25 = arith.constant 0 : index
    %c0_26 = arith.constant 0 : index
    %c0_27 = arith.constant 0 : index
    %38 = vector.load %arg8[%c0_25, %c0_26, %c0_27] : memref<1x8x1xf32, #tpu.memory_space<vmem>>, vector<1x8x1xf32>
    %39 = vector.shape_cast %38 : vector<1x8x1xf32> to vector<8x1xf32>
    %40 = vector.shape_cast %13 : vector<8x1xf32> to vector<1x8x1xf32>
    tpu.vector_store %arg8[%c0_25, %c0_26, %c0_27], %40 {strides = array<i32>} : memref<1x8x1xf32, #tpu.memory_space<vmem>>, vector<1x8x1xf32>,
    %c0_i32_28 = arith.constant 0 : i32
    %41 = arith.cmpi eq, %arg1, %c0_i32_28 : i32
    %42 = arith.extui %41 : i1 to i32
    %c0_i32_29 = arith.constant 0 : i32
    %43 = arith.cmpi ne, %42, %c0_i32_29 : i32
    scf.if %43 {
      %c0_30 = arith.constant 0 : index
      %c0_31 = arith.constant 0 : index
      %c0_32 = arith.constant 0 : index
      %44 = vector.load %arg10[%c0_30, %c0_31, %c0_32] : memref<1x8x32xf32, #tpu.memory_space<vmem>>, vector<1x8x32xf32>
      %c0_33 = arith.constant 0 : index
      %c0_34 = arith.constant 0 : index
      %c0_35 = arith.constant 0 : index
      %45 = vector.load %arg9[%c0_33, %c0_34, %c0_35] : memref<1x8x1xf32, #tpu.memory_space<vmem>>, vector<1x8x1xf32>
      %cst_36 = arith.constant 1.000000e+00 : f32
      %46 = vector.broadcast %cst_36 : f32 to vector<1x8x1xf32>
      %47 = arith.divf %46, %45 : vector<1x8x1xf32>
      %48 = vector.broadcast %47 : vector<1x8x1xf32> to vector<1x8x32xf32>
      %49 = arith.mulf %44, %48 : vector<1x8x32xf32>
      %c0_37 = arith.constant 0 : index
      %c0_38 = arith.constant 0 : index
      %50 = vector.load %arg5[%c0_37, %c0_38] : memref<8x32xf32, #tpu.memory_space<vmem>>, vector<8x32xf32>
      %51 = vector.shape_cast %50 : vector<8x32xf32> to vector<1x8x32xf32>
      %52 = arith.mulf %49, %51 : vector<1x8x32xf32>
      %cst_39 = arith.constant dense<0.000000e+00> : vector<1x8xf32>
      %53 = vector.multi_reduction <add>, %52, %cst_39 [2] : vector<1x8x32xf32> to vector<1x8xf32>
      %c0_40 = arith.constant 0 : index
      %c0_41 = arith.constant 0 : index
      %54 = vector.load %arg6[%c0_40, %c0_41] : memref<1x8xf32, #tpu.memory_space<vmem>>, vector<1x8xf32>
      %55 = arith.addf %53, %54 : vector<1x8xf32>
      %56 = vector.shape_cast %55 : vector<1x8xf32> to vector<1x1x8xf32>
      %c0_42 = arith.constant 0 : index
      %c0_43 = arith.constant 0 : index
      %c0_44 = arith.constant 0 : index
      %57 = vector.load %arg7[%c0_42, %c0_43, %c0_44] : memref<1x1x8xf32, #tpu.memory_space<vmem>>, vector<1x1x8xf32>
      tpu.vector_store %arg7[%c0_42, %c0_43, %c0_44], %56 {strides = array<i32>} : memref<1x1x8xf32, #tpu.memory_space<vmem>>, vector<1x1x8xf32>,
    } else {
    }
    return
  }
  func.func @transform_0(%arg0: i32, %arg1: i32) -> (i32, i32) {
    %c0_i32 = arith.constant 0 : i32
    %c0_i32_0 = arith.constant 0 : i32
    %c0_i32_1 = arith.constant 0 : i32
    return %c0_i32, %c0_i32_0 : i32, i32
  }
  func.func @transform_1(%arg0: i32, %arg1: i32) -> (i32, i32, i32) {
    %c0_i32 = arith.constant 0 : i32
    %c0_i32_0 = arith.constant 0 : i32
    return %arg0, %arg1, %c0_i32 : i32, i32, i32
  }
  func.func @transform_2(%arg0: i32, %arg1: i32) -> (i32, i32) {
    %c0_i32 = arith.constant 0 : i32
    %c0_i32_0 = arith.constant 0 : i32
    return %c0_i32, %arg1 : i32, i32
  }
  func.func @transform_3(%arg0: i32, %arg1: i32) -> (i32, i32) {
    %c0_i32 = arith.constant 0 : i32
    %c0_i32_0 = arith.constant 0 : i32
    %c0_i32_1 = arith.constant 0 : i32
    return %c0_i32, %c0_i32_0 : i32, i32
  }
  func.func @transform_4(%arg0: i32, %arg1: i32) -> (i32, i32) {
    %c0_i32 = arith.constant 0 : i32
    %c0_i32_0 = arith.constant 0 : i32
    %c0_i32_1 = arith.constant 0 : i32
    return %c0_i32, %c0_i32_0 : i32, i32
  }
  func.func @transform_5(%arg0: i32, %arg1: i32) -> (i32, i32, i32) {
    %c0_i32 = arith.constant 0 : i32
    %c0_i32_0 = arith.constant 0 : i32
    %c0_i32_1 = arith.constant 0 : i32
    return %arg0, %c0_i32, %c0_i32_0 : i32, i32, i32
  }
}

</mosaic_0001>

<bundles_post_ra>
// kernel: qeruy2label_forward.2
= control target key start
LH: loop header
LB: loop body
LE: loop exit
PB: predicated region body
PF: predicated region fallthrough
CT: control target
= control target key end

     0   :  { %s941_s12 = smov 0   ;;  %s1105_s0 = inlined_call_operand.vmem [shape: bf16[512,4], index: 0, kind: input, shape index: {}]   ;;  %s1106_s1 = inlined_call_operand.vmem [shape: bf16[4,32], index: 1, kind: input, shape index: {}]   ;;  %s1107_s2 = inlined_call_operand.vmem [shape: f32[1,32], index: 2, kind: input, shape index: {}]   ;;  %s1108_s3 = inlined_call_operand.vmem [shape: bf16[512,32], index: 3, kind: output, shape index: {}]  }
   0x1 LB: > { %s726_s13 = sadd.s32 4294967295, %s919_s12   ;;  %p730_p0 = scmp.ge.s32.totalorder %s919_s12, 1  ;;  %s919_s12 = sphi %s941_s12, %s13_s12  }
   0x2   : > { %p138_p1 = scmp.lt.s32.totalorder %s919_s12, 3 }
   0x4   : > { %p139_p2 = pnand %p730_p0, %p138_p1 }
   0x5   : > { %v207_v0 = vld [vmem:[%s1106_s1] sm:$0x3] (!%p139_p2)  ;;  %vm344_vm0 = vcmask (!%p139_p2), 1041408   ;;  %s731_s16 = sshll.u32 (!%p139_p2), %s726_s13, 5  ;;  %vm295_vm1 = vcmask (!%p139_p2), 31744   ;;  %vm637_vm2 = vcmask (!%p139_p2), 257024  }
   0x6   : > { %142 = sbr.rel (%p139_p2) target bundleno = 263 (0x107), region = 32  ;;  %887 = vmatprep.subr.msk.bf16.mxu0 (!%p139_p2), %vm344_vm0, %v207_v0  ;;  %888 = vmatprep.subr.msk.bf16.mxu1 (!%p139_p2), %vm344_vm0, %v207_v0  ;;  %v346_v1 = vsel (!%p139_p2), %vm344_vm0, %v207_v0, 0  ;;  %p163_p3 = scmp.lt.s32.totalorder (!%p139_p2), %s731_s16, 63  ;;  %v997_v18 = vld [vmem:[%s1107_s2] ss:$0 sm:$0xff] (!%p139_p2) }
   0x7   : > { %852 = vmatpush3.bf16.msra.mxu0 (!%p139_p2), %v346_v1  ;;  %886 = vmatpush3.bf16.msra.mxu1 (!%p139_p2), %v346_v1 }
   0xd   : > { %s1110_s16 = smov (!%p163_p3, %s731_s16), 63 }
   0xe   : > { %s732_s17 = sshll.u32 %s1110_s16, 2 }
   0xf   : > { %s960_s20 = scalar_lea.vmem %s1105_s0, %s732_s17  ;;  %s1005_s25 = scalar_lea.vmem %s1108_s3, %s732_s17 }
  0x10   : > { %v897_v2 = vld [vmem:[%s960_s20] sm:$0xff]   ;;  %v899_v4 = vld [vmem:[%s960_s20 + $0x8] sm:$0xff]   ;;  %v901_v6 = vld [vmem:[%s960_s20 + $0x10] sm:$0xff]  }
  0x11   : > { %v898_v3 = vld [vmem:[%s960_s20 + $0x40] sm:$0xff]   ;;  %853 = vmatprep.mubr.msk.bf16.mxu0 %vm295_vm1, %v897_v2  ;;  %v900_v5 = vld [vmem:[%s960_s20 + $0x48] sm:$0xff]   ;;  %v902_v7 = vld [vmem:[%s960_s20 + $0x50] sm:$0xff]  }
  0x12   : > { %869 = vmatprep.mubr.msk.bf16.mxu1 %vm295_vm1, %v898_v3  ;;  %854 = vmatmul.mubr.msk.bf16.vlgmr.msra.gmra.mrb[0].mxu0 %vm295_vm1, %v899_v4  ;;  %v903_v8 = vld [vmem:[%s960_s20 + $0x18] sm:$0xff]   ;;  %v905_v10 = vld [vmem:[%s960_s20 + $0x20] sm:$0xff]   ;;  %v907_v12 = vld [vmem:[%s960_s20 + $0x28] sm:$0xff]  }
  0x13   : > { %870 = vmatmul.mubr.msk.bf16.vlgmr.msra.gmra.mrb[0].mxu1 %vm295_vm1, %v900_v5  ;;  %857 = vmatprep.mubr.msk.bf16.mxu0 %vm295_vm1, %v901_v6  ;;  %v904_v9 = vld [vmem:[%s960_s20 + $0x58] sm:$0xff]   ;;  %v906_v11 = vld [vmem:[%s960_s20 + $0x60] sm:$0xff]   ;;  %v908_v13 = vld [vmem:[%s960_s20 + $0x68] sm:$0xff]  }
  0x14   : > { %873 = vmatprep.mubr.msk.bf16.mxu1 %vm295_vm1, %v902_v7  ;;  %v909_v14 = vld [vmem:[%s960_s20 + $0x30] sm:$0xff]   ;;  %v911_v16 = vld [vmem:[%s960_s20 + $0x38] sm:$0xff]  }
  0x15   : > { %v910_v15 = vld [vmem:[%s960_s20 + $0x70] sm:$0xff]   ;;  %v912_v17 = vld [vmem:[%s960_s20 + $0x78] sm:$0xff]  }
  0x1a   : > { %858 = vmatmul.mubr.msk.bf16.gmra.mrb[4].mxu0 %vm295_vm1, %v903_v8 }
  0x1b   : > { %874 = vmatmul.mubr.msk.bf16.gmra.mrb[4].mxu1 %vm295_vm1, %v904_v9  ;;  %861 = vmatprep.mubr.msk.bf16.mxu0 %vm295_vm1, %v905_v10 }
  0x1c   : > { %877 = vmatprep.mubr.msk.bf16.mxu1 %vm295_vm1, %v906_v11 }
  0x22   : > { %862 = vmatmul.mubr.msk.bf16.gmra.mrb[8].mxu0 %vm295_vm1, %v907_v12 }
  0x23   : > { %878 = vmatmul.mubr.msk.bf16.gmra.mrb[8].mxu1 %vm295_vm1, %v908_v13  ;;  %865 = vmatprep.mubr.msk.bf16.mxu0 %vm295_vm1, %v909_v14 }
  0x24   : > { %881 = vmatprep.mubr.msk.bf16.mxu1 %vm295_vm1, %v910_v15 }
  0x2a   : > { %866 = vmatmul.mubr.msk.bf16.gmra.mrb[12].mxu0 %vm295_vm1, %v911_v16 }
  0x2b   : > { %882 = vmatmul.mubr.msk.bf16.gmra.mrb[12].mxu1 %vm295_vm1, %v912_v17 }
  0xe5   : > { %v855_v19 = vpop.f32.mrb[0].mxu0 }
  0xe6   : > { %v391_v20 = vadd.f32 %v855_v19, %v997_v18  ;;  %v871_v21 = vpop.f32.mrb[0].mxu1  ;;  %v382_v22 = vpop.f32.mrb[1].mxu0 }
  0xe7   : > { %v455_v23 = vadd.f32 %v871_v21, %v997_v18  ;;  %v383_v24 = vadd.f32 %v997_v18, %v382_v22  ;;  %v446_v25 = vpop.f32.mrb[1].mxu1  ;;  %v856_v26 = vpop.f32.mrb[2].mxu0 }
  0xe8   : > { %v804_v27 = vpack.c.bf16 %v391_v20, %v391_v20  ;;  %v447_v28 = vadd.f32 %v997_v18, %v446_v25  ;;  %v394_v29 = vadd.f32 %v856_v26, %v997_v18  ;;  %v872_v30 = vpop.f32.mrb[2].mxu1  ;;  %v385_v31 = vpop.f32.mrb[3].mxu0 }
  0xe9   : > { %v820_v32 = vpack.c.bf16 %v455_v23, %v455_v23  ;;  %v802_v33 = vpack.c.bf16 %v383_v24, %v383_v24  ;;  %v458_v34 = vadd.f32 %v872_v30, %v997_v18  ;;  %v386_v35 = vadd.f32 %v997_v18, %v385_v31  ;;  %v449_v36 = vpop.f32.mrb[3].mxu1 }
  0xea   : > { %640 = vst.msk [vmem:[%s1005_s25 + $0x8] sm:$0xf] %vm637_vm2, %v804_v27  ;;  %v818_v37 = vpack.c.bf16 %v447_v28, %v447_v28  ;;  %v805_v38 = vpack.c.bf16 %v394_v29, %v394_v29  ;;  %v450_v39 = vadd.f32 %v997_v18, %v449_v36 }
  0xeb   : > { %656 = vst.msk [vmem:[%s1005_s25 + $0x48] sm:$0xf] %vm637_vm2, %v820_v32  ;;  %638 = vst.msk [vmem:[%s1005_s25] sm:$0xf] %vm637_vm2, %v802_v33  ;;  %v821_v40 = vpack.c.bf16 %v458_v34, %v458_v34  ;;  %v803_v41 = vpack.c.bf16 %v386_v35, %v386_v35 }
  0xec   : > { %654 = vst.msk [vmem:[%s1005_s25 + $0x40] sm:$0xf] %vm637_vm2, %v818_v37  ;;  %641 = vst.msk [vmem:[%s1005_s25 + $0xc] sm:$0xf] %vm637_vm2, %v805_v38  ;;  %v819_v42 = vpack.c.bf16 %v450_v39, %v450_v39 }
  0xed   : > { %657 = vst.msk [vmem:[%s1005_s25 + $0x4c] sm:$0xf] %vm637_vm2, %v821_v40  ;;  %639 = vst.msk [vmem:[%s1005_s25 + $0x4] sm:$0xf] %vm637_vm2, %v803_v41  ;;  %v859_v43 = vpop.f32.mrb[4].mxu0 }
  0xee   : > { %655 = vst.msk [vmem:[%s1005_s25 + $0x44] sm:$0xf] %vm637_vm2, %v819_v42  ;;  %v407_v44 = vadd.f32 %v859_v43, %v997_v18  ;;  %v875_v45 = vpop.f32.mrb[4].mxu1  ;;  %v398_v46 = vpop.f32.mrb[5].mxu0 }
  0xef   : > { %v471_v47 = vadd.f32 %v875_v45, %v997_v18  ;;  %v399_v48 = vadd.f32 %v997_v18, %v398_v46  ;;  %v462_v49 = vpop.f32.mrb[5].mxu1  ;;  %v860_v50 = vpop.f32.mrb[6].mxu0 }
  0xf0   : > { %v808_v51 = vpack.c.bf16 %v407_v44, %v407_v44  ;;  %v463_v52 = vadd.f32 %v997_v18, %v462_v49  ;;  %v410_v53 = vadd.f32 %v860_v50, %v997_v18  ;;  %v876_v54 = vpop.f32.mrb[6].mxu1  ;;  %v401_v55 = vpop.f32.mrb[7].mxu0 }
  0xf1   : > { %v824_v56 = vpack.c.bf16 %v471_v47, %v471_v47  ;;  %v806_v57 = vpack.c.bf16 %v399_v48, %v399_v48  ;;  %v474_v58 = vadd.f32 %v876_v54, %v997_v18  ;;  %v402_v59 = vadd.f32 %v997_v18, %v401_v55  ;;  %v465_v60 = vpop.f32.mrb[7].mxu1 }
  0xf2   : > { %644 = vst.msk [vmem:[%s1005_s25 + $0x18] sm:$0xf] %vm637_vm2, %v808_v51  ;;  %v822_v61 = vpack.c.bf16 %v463_v52, %v463_v52  ;;  %v809_v62 = vpack.c.bf16 %v410_v53, %v410_v53  ;;  %v466_v63 = vadd.f32 %v997_v18, %v465_v60 }
  0xf3   : > { %660 = vst.msk [vmem:[%s1005_s25 + $0x58] sm:$0xf] %vm637_vm2, %v824_v56  ;;  %642 = vst.msk [vmem:[%s1005_s25 + $0x10] sm:$0xf] %vm637_vm2, %v806_v57  ;;  %v825_v0 = vpack.c.bf16 %v474_v58, %v474_v58  ;;  %v807_v1 = vpack.c.bf16 %v402_v59, %v402_v59 }
  0xf4   : > { %658 = vst.msk [vmem:[%s1005_s25 + $0x50] sm:$0xf] %vm637_vm2, %v822_v61  ;;  %645 = vst.msk [vmem:[%s1005_s25 + $0x1c] sm:$0xf] %vm637_vm2, %v809_v62  ;;  %v823_v2 = vpack.c.bf16 %v466_v63, %v466_v63 }
  0xf5   : > { %661 = vst.msk [vmem:[%s1005_s25 + $0x5c] sm:$0xf] %vm637_vm2, %v825_v0  ;;  %643 = vst.msk [vmem:[%s1005_s25 + $0x14] sm:$0xf] %vm637_vm2, %v807_v1  ;;  %v863_v3 = vpop.f32.mrb[8].mxu0 }
  0xf6   : > { %659 = vst.msk [vmem:[%s1005_s25 + $0x54] sm:$0xf] %vm637_vm2, %v823_v2  ;;  %v423_v4 = vadd.f32 %v863_v3, %v997_v18  ;;  %v879_v5 = vpop.f32.mrb[8].mxu1  ;;  %v414_v6 = vpop.f32.mrb[9].mxu0 }
  0xf7   : > { %v487_v7 = vadd.f32 %v879_v5, %v997_v18  ;;  %v415_v8 = vadd.f32 %v997_v18, %v414_v6  ;;  %v478_v9 = vpop.f32.mrb[9].mxu1  ;;  %v864_v10 = vpop.f32.mrb[10].mxu0 }
  0xf8   : > { %v812_v11 = vpack.c.bf16 %v423_v4, %v423_v4  ;;  %v479_v12 = vadd.f32 %v997_v18, %v478_v9  ;;  %v426_v13 = vadd.f32 %v864_v10, %v997_v18  ;;  %v880_v14 = vpop.f32.mrb[10].mxu1  ;;  %v417_v15 = vpop.f32.mrb[11].mxu0 }
  0xf9   : > { %v828_v16 = vpack.c.bf16 %v487_v7, %v487_v7  ;;  %v810_v17 = vpack.c.bf16 %v415_v8, %v415_v8  ;;  %v490_v19 = vadd.f32 %v880_v14, %v997_v18  ;;  %v418_v20 = vadd.f32 %v997_v18, %v417_v15  ;;  %v481_v21 = vpop.f32.mrb[11].mxu1 }
  0xfa   : > { %648 = vst.msk [vmem:[%s1005_s25 + $0x28] sm:$0xf] %vm637_vm2, %v812_v11  ;;  %v826_v22 = vpack.c.bf16 %v479_v12, %v479_v12  ;;  %v813_v23 = vpack.c.bf16 %v426_v13, %v426_v13  ;;  %v482_v24 = vadd.f32 %v997_v18, %v481_v21 }
  0xfb   : > { %664 = vst.msk [vmem:[%s1005_s25 + $0x68] sm:$0xf] %vm637_vm2, %v828_v16  ;;  %646 = vst.msk [vmem:[%s1005_s25 + $0x20] sm:$0xf] %vm637_vm2, %v810_v17  ;;  %v829_v25 = vpack.c.bf16 %v490_v19, %v490_v19  ;;  %v811_v26 = vpack.c.bf16 %v418_v20, %v418_v20 }
  0xfc   : > { %662 = vst.msk [vmem:[%s1005_s25 + $0x60] sm:$0xf] %vm637_vm2, %v826_v22  ;;  %649 = vst.msk [vmem:[%s1005_s25 + $0x2c] sm:$0xf] %vm637_vm2, %v813_v23  ;;  %v827_v27 = vpack.c.bf16 %v482_v24, %v482_v24 }
  0xfd   : > { %665 = vst.msk [vmem:[%s1005_s25 + $0x6c] sm:$0xf] %vm637_vm2, %v829_v25  ;;  %647 = vst.msk [vmem:[%s1005_s25 + $0x24] sm:$0xf] %vm637_vm2, %v811_v26  ;;  %v867_v28 = vpop.f32.mrb[12].mxu0 }
  0xfe   : > { %663 = vst.msk [vmem:[%s1005_s25 + $0x64] sm:$0xf] %vm637_vm2, %v827_v27  ;;  %v439_v29 = vadd.f32 %v867_v28, %v997_v18  ;;  %v883_v30 = vpop.f32.mrb[12].mxu1  ;;  %v430_v31 = vpop.f32.mrb[13].mxu0 }
  0xff   : > { %v503_v32 = vadd.f32 %v883_v30, %v997_v18  ;;  %v431_v33 = vadd.f32 %v997_v18, %v430_v31  ;;  %v494_v34 = vpop.f32.mrb[13].mxu1  ;;  %v868_v35 = vpop.f32.mrb[14].mxu0 }
 0x100   : > { %v816_v36 = vpack.c.bf16 %v439_v29, %v439_v29  ;;  %v495_v37 = vadd.f32 %v997_v18, %v494_v34  ;;  %v442_v38 = vadd.f32 %v868_v35, %v997_v18  ;;  %v884_v39 = vpop.f32.mrb[14].mxu1  ;;  %v433_v40 = vpop.f32.mrb[15].mxu0 }
 0x101   : > { %v832_v41 = vpack.c.bf16 %v503_v32, %v503_v32  ;;  %v814_v42 = vpack.c.bf16 %v431_v33, %v431_v33  ;;  %v506_v43 = vadd.f32 %v884_v39, %v997_v18  ;;  %v434_v44 = vadd.f32 %v997_v18, %v433_v40  ;;  %v497_v45 = vpop.f32.mrb[15].mxu1 }
 0x102   : > { %652 = vst.msk [vmem:[%s1005_s25 + $0x38] sm:$0xf] %vm637_vm2, %v816_v36  ;;  %v830_v46 = vpack.c.bf16 %v495_v37, %v495_v37  ;;  %v817_v47 = vpack.c.bf16 %v442_v38, %v442_v38  ;;  %v498_v48 = vadd.f32 %v997_v18, %v497_v45 }
 0x103   : > { %668 = vst.msk [vmem:[%s1005_s25 + $0x78] sm:$0xf] %vm637_vm2, %v832_v41  ;;  %650 = vst.msk [vmem:[%s1005_s25 + $0x30] sm:$0xf] %vm637_vm2, %v814_v42  ;;  %v833_v49 = vpack.c.bf16 %v506_v43, %v506_v43  ;;  %v815_v50 = vpack.c.bf16 %v434_v44, %v434_v44 }
 0x104   : > { %666 = vst.msk [vmem:[%s1005_s25 + $0x70] sm:$0xf] %vm637_vm2, %v830_v46  ;;  %653 = vst.msk [vmem:[%s1005_s25 + $0x3c] sm:$0xf] %vm637_vm2, %v817_v47  ;;  %v831_v51 = vpack.c.bf16 %v498_v48, %v498_v48 }
 0x105   : > { %669 = vst.msk [vmem:[%s1005_s25 + $0x7c] sm:$0xf] %vm637_vm2, %v833_v49  ;;  %651 = vst.msk [vmem:[%s1005_s25 + $0x34] sm:$0xf] %vm637_vm2, %v815_v50 }
 0x106   : > { %667 = vst.msk [vmem:[%s1005_s25 + $0x74] sm:$0xf] %vm637_vm2, %v831_v51 }
 0x107 PF: > { %s13_s12 = sadd.s32 1, %s919_s12  }
 0x108   : > { %p10_p4 = scmp.ge.s32.totalorder %s13_s12, 4  }
 0x10a   :  { %12 = sbr.rel (!%p10_p4) target bundleno = 1 (0x1), region = 62 }

// kernel: qeruy2label_forward.3
= control target key start
LH: loop header
LB: loop body
LE: loop exit
PB: predicated region body
PF: predicated region fallthrough
CT: control target
= control target key end

     0   :  { %10 = vsyncpa [#allocation6], 0  ;;  %s1170_s0 = inlined_call_operand.vmem [shape: bf16[8,32], index: 0, kind: input, shape index: {}]   ;;  %s1171_s1 = inlined_call_operand.vmem [shape: bf16[2,256,32], index: 1, kind: input, shape index: {}]   ;;  %s1172_s2 = inlined_call_operand.vmem [shape: f32[8,256], index: 2, kind: input, shape index: {}]   ;;  %s1173_s3 = inlined_call_operand.vmem [shape: f32[8,32], index: 3, kind: input, shape index: {}]   ;;  %s1174_s4 = inlined_call_operand.vmem [shape: f32[1,8], index: 4, kind: input, shape index: {}]   ;;  %s1175_s5 = inlined_call_operand.hbm [shape: f32[2,1,8], index: 5, kind: output, shape index: {}]  }
   0x1   :  { %12 = vsyncpa [#allocation6 + $0x1], 0  ;;  %s1000_s18 = smov 0   ;;  %s1002_s19 = smov 0  }
   0x2   :  { %s1004_s20 = smov 0   ;;  %s1006_s21 = smov 0  }
   0x3   :  { %s1008_s22 = smov 0   ;;  %s1010_s23 = smov 0  }
   0x4 LB: > { %s724_s24 = sadd.s32 4294967295, %s964_s23   ;;  %s725_s25 = sadd.s32 4294967294, %s964_s23   ;;  %s964_s23 = sphi %s1010_s23, %s18_s23   ;;  %s960_s22 = sphi %s1008_s22, %s1182_s22   ;;  %s956_s21 = sphi %s1006_s21, %s1181_s21   ;;  %s952_s20 = sphi %s1004_s20, %s1180_s20   ;;  %s948_s19 = sphi %s1002_s19, %s1179_s19   ;;  %s944_s18 = sphi %s1000_s18, %s1178_s18  }
   0x5   : > { %s30_s26 = sadd.s32 1, %s960_s22  ;;  %s154_s27 = sadd.s32 1, %s952_s20 }
   0x6   : > { %p32_p0 = scmp.ge.s32.totalorder %s30_s26, 2  ;;  %p164_p1 = scmp.ne.s32.totalorder %s952_s20, %s948_s19 }
   0x7   : > { %p165_p2 = scmp.eq.s32.totalorder %s724_s24, 1  ;;  %p170_p3 = scmp.ne.s32.totalorder %s948_s19, %s944_s18 }
   0x8   : > { %s1184_s26 = smov (%p32_p0, %s30_s26), 0  ;;  %p171_p5 = scmp.eq.s32.totalorder %s725_s25, 1 }
   0x9   : > { %p1040_p4 = por %p165_p2, %p164_p1  ;;  %s151_s29 = ssub.s32 %s960_s22, %s1184_s26 }
   0xa   : > { %p729_p6 = scmp.ge.s32.totalorder %s964_s23, 1  ;;  %p152_p7 = scmp.eq.s32.totalorder %s151_s29, 0 }
   0xb   : > { %p1047_p8 = por %p171_p5, %p170_p3  ;;  %p220_p9 = scmp.lt.s32.totalorder %s964_s23, 3 }
   0xc   : > { %s1053_s6 = scalar_select %p152_p7, %s952_s20, %s154_s27  }
   0xd   : > { %p221_p10 = pnand %p729_p6, %p220_p9 }
   0xe   : > { %p257_p11 = scmp.lt.s32.totalorder (!%p221_p10), %s956_s21, 1  ;;  %vm280_vm0 = vcmask (!%p221_p10), 261120   ;;  %v282_v0 = vld [vmem:[%s1170_s0] sm:$0xf] (!%p221_p10)  ;;  %vm277_vm1 = vcmask (!%p221_p10), 7168   ;;  %v966_v25 = vmov (!%p221_p10), -inf  }
   0xf   : > { %224 = sbr.rel (%p221_p10) target bundleno = 1183 (0x49f), region = 40  ;;  %770 = vmatprep.mubr.msk.bf16.mxu0 (!%p221_p10), %vm280_vm0, %v282_v0  ;;  %278 = vst.msk [vmem:[#allocation2] sm:$0xff] (!%p221_p10), %vm277_vm1, %v966_v25  ;;  %v283_v26 = vld [vmem:[%s1172_s2] sm:$0xff] (!%p221_p10)  ;;  %v284_v27 = vld [vmem:[%s1172_s2 + $0x8] sm:$0xff] (!%p221_p10)  ;;  %v967_v35 = vmov (!%p221_p10), 0   ;;  %v968_v36 = vmov (!%p221_p10), 0.0  }
  0x10   : > { %860 = vset.pattern.permute.xlu0 (!%p221_p10), %v967_v35  ;;  %861 = vset.pattern.permute.xlu1 (!%p221_p10), %v967_v35  ;;  %279 = vst.msk [vmem:[#allocation3] sm:$0xff] (!%p221_p10), %vm277_vm1, %v968_v36  ;;  %v749_v59 = vld [vmem:[%s1174_s4] ss:$0 sm:$0xff] (!%p221_p10)  ;;  %s254_s7 = sand.u32 (!%p221_p10), 1, %s948_s19   ;;  %s750_s8 = sshll.u32 (!%p221_p10), %s956_s21, 4  ;;  %vm625_vm2 = vcmask (!%p221_p10), 57344  }
  0x11   : > { %281 = vst.msk [vmem:[#allocation4] sm:$0xff] (!%p221_p10), %vm280_vm0, %v968_v36  ;;  %s628_s14 = scalar_lea.sflag (!%p221_p10), [#allocation6], %s254_s7 }
  0x16   : > { %s258_s9 = scalar_select %p257_p11, %s956_s21, 1  ;;  %v490_v37 = vld [vmem:[#allocation2] sm:$0xff] }
  0x17   : > { %v509_v53 = vld [vmem:[#allocation3] sm:$0xff]  ;;  %s969_s21 = smov [#allocation5]  }
  0x18   : > { %s753_s10 = sshll.u32 %s258_s9, 7  ;;  %v517_v60 = vld [vmem:[#allocation4] sm:$0xff]  ;;  %s255_s9 = scalar_lea.vmem [#allocation5], %s254_s7 }
  0x19   : > { %s1064_s13 = scalar_lea.vmem %s1171_s1, %s753_s10  ;;  %s640_s10 = sshll.u32 %s255_s9, 4  ;;  %s1125_s10 = int_to_ptr.vmem [resolvable:$true] %s640_s10 }
  0x1a   : > { %v862_v1 = vld [vmem:[%s1064_s13 + $0x40] sm:$0xff]   ;;  %v864_v3 = vld [vmem:[%s1064_s13 + $0x48] sm:$0xff]   ;;  %v866_v6 = vld [vmem:[%s1064_s13 + $0x50] sm:$0xff]   ;;  %s886_s15 = scalar_lea.vmem %s1125_s10, 16  ;;  %s890_s16 = sshll.u32 %s969_s21, 4  ;;  %s891_s16 = int_to_ptr.vmem [resolvable:$false] %s890_s16 }
  0x1b   : > { %v863_v2 = vld [vmem:[%s1064_s13] sm:$0xff]   ;;  %794 = vmatprep.subr.msk.bf16.mxu0 %vm280_vm0, %v862_v1  ;;  %772 = vmatprep.subr.bf16.mxu1 %v862_v1  ;;  %v865_v5 = vld [vmem:[%s1064_s13 + $0x8] sm:$0xff]   ;;  %v867_v8 = vld [vmem:[%s1064_s13 + $0x10] sm:$0xff]   ;;  %p887_p12 = scmp.ne.s32.totalorder %s1125_s10, %s886_s15  ;;  %s892_s17 = scalar_lea.vmem %s891_s16, 32 }
  0x1c   : > { %v402_v4 = vsel %vm280_vm0, %v863_v2, 0  ;;  %773 = vmatpush3.bf16.msra.mxu1 %v863_v2  ;;  %v405_v7 = vsel %vm280_vm0, %v865_v5, 0  ;;  %v868_v9 = vld [vmem:[%s1064_s13 + $0x58] sm:$0xff]   ;;  %v870_v11 = vld [vmem:[%s1064_s13 + $0x60] sm:$0xff]   ;;  %v408_v12 = vsel %vm280_vm0, %v867_v8, 0  ;;  %v872_v14 = vld [vmem:[%s1064_s13 + $0x68] sm:$0xff]   ;;  %p893_p1 = scmp.lt.s32.totalorder %s1125_s10, %s891_s16  ;;  %p894_p2 = scmp.lt.s32.totalorder %s892_s17, %s886_s15 }
  0x1d   : > { %755 = vmatpush3.bf16.xpose.msra.mxu0 %v402_v4  ;;  %774 = vmatprep.subr.bf16.mxu1 %v864_v3  ;;  %v869_v10 = vld [vmem:[%s1064_s13 + $0x18] sm:$0xff]   ;;  %v871_v13 = vld [vmem:[%s1064_s13 + $0x20] sm:$0xff]   ;;  %v873_v15 = vld [vmem:[%s1064_s13 + $0x28] sm:$0xff]   ;;  %p888_p13 = pnand %p887_p12, %p1040_p4 }
  0x1e   : > { %795 = vmatprep.subr.msk.bf16.mxu0 %vm280_vm0, %v864_v3  ;;  %v874_v16 = vld [vmem:[%s1064_s13 + $0x70] sm:$0xff]   ;;  %v411_v17 = vsel %vm280_vm0, %v869_v10, 0  ;;  %v876_v19 = vld [vmem:[%s1064_s13 + $0x78] sm:$0xff]   ;;  %v414_v21 = vsel %vm280_vm0, %v871_v13, 0  ;;  %v417_v22 = vsel %vm280_vm0, %v873_v15, 0  ;;  %p895_p3 = por %p894_p2, %p893_p1 }
  0x1f   : > { %v875_v18 = vld [vmem:[%s1064_s13 + $0x30] sm:$0xff]   ;;  %v877_v20 = vld [vmem:[%s1064_s13 + $0x38] sm:$0xff]   ;;  %s1123_s13 = scalar_lea.hbm %s1175_s5, %s750_s8  ;;  %p889_p0 = pneg %p888_p13 }
  0x20   : > { %775 = vmatpush3.bf16.msra.mxu1 %v865_v5  ;;  %v420_v23 = vsel %vm280_vm0, %v875_v18, 0  ;;  %v423_v24 = vsel %vm280_vm0, %v877_v20, 0 }
  0x21   : > { %776 = vmatprep.subr.bf16.mxu1 %v866_v6  ;;  %p896_p5 = pnand %p895_p3, %p889_p0 }
  0x24   : > { %777 = vmatpush3.bf16.msra.mxu1 %v867_v8 }
  0x25   : > { %757 = vmatpush3.bf16.xpose.msra.mxu0 %v405_v7  ;;  %778 = vmatprep.subr.bf16.mxu1 %v868_v9  ;;  %v598_v7 = vld [vmem:[%s1173_s3] sm:$0xff] }
  0x26   : > { %796 = vmatprep.subr.msk.bf16.mxu0 %vm280_vm0, %v866_v6 }
  0x28   : > { %779 = vmatpush3.bf16.msra.mxu1 %v869_v10 }
  0x29   : > { %780 = vmatprep.subr.bf16.mxu1 %v870_v11 }
  0x2c   : > { %781 = vmatpush3.bf16.msra.mxu1 %v871_v13 }
  0x2d   : > { %759 = vmatpush3.bf16.xpose.msra.mxu0 %v408_v12  ;;  %782 = vmatprep.subr.bf16.mxu1 %v872_v14 }
  0x2e   : > { %797 = vmatprep.subr.msk.bf16.mxu0 %vm280_vm0, %v868_v9 }
  0x30   : > { %783 = vmatpush3.bf16.msra.mxu1 %v873_v15 }
  0x31   : > { %784 = vmatprep.subr.bf16.mxu1 %v874_v16 }
  0x34   : > { %785 = vmatpush3.bf16.msra.mxu1 %v875_v18 }
  0x35   : > { %761 = vmatpush3.bf16.xpose.msra.mxu0 %v411_v17  ;;  %786 = vmatprep.subr.bf16.mxu1 %v876_v19 }
  0x36   : > { %798 = vmatprep.subr.msk.bf16.mxu0 %vm280_vm0, %v870_v11 }
  0x38   : > { %787 = vmatpush3.bf16.msra.mxu1 %v877_v20 }
  0x3d   : > { %763 = vmatpush3.bf16.xpose.msra.mxu0 %v414_v21 }
  0x3e   : > { %799 = vmatprep.subr.msk.bf16.mxu0 %vm280_vm0, %v872_v14  ;;  %v618_v14 = vlaneseq }
  0x40   : > { %v619_v15 = vand.u32 127, %v618_v14 }
  0x45   : > { %765 = vmatpush3.bf16.xpose.msra.mxu0 %v417_v22 }
  0x46   : > { %800 = vmatprep.subr.msk.bf16.mxu0 %vm280_vm0, %v874_v16  ;;  %v621_v16 = vshrl.u32 %v618_v14, 7 }
  0x48   : > { %v622_v17 = vsub.s32 %v619_v15, %v621_v16 }
  0x4d   : > { %767 = vmatpush3.bf16.xpose.msra.mxu0 %v420_v23 }
  0x4e   : > { %801 = vmatprep.subr.msk.bf16.mxu0 %vm280_vm0, %v876_v19 }
  0x55   : > { %769 = vmatpush3.bf16.xpose.msra.mxu0 %v423_v24 }
  0x5c   : > { %771 = vmatmul.mubr.msk.bf16.vlgmr.msra.gmra.mrb[0].mxu0 %vm280_vm0, %v282_v0 }
 0x12f   : > { %v483_v28 = vpop.f32.mrb[0].mxu0 }
 0x130   : > { %v484_v29 = vadd.f32 %v483_v28, %v283_v26  ;;  %v485_v30 = vpop.f32.mrb[1].mxu0 }
 0x131   : > { %v486_v31 = vadd.f32 %v485_v30, %v284_v27  ;;  %v487_v32 = vpop.f32.mrb[2].mxu0 }
 0x132   : > { %v488_v33 = vpop.f32.mrb[3].mxu0 }
 0x133   : > { %v491_v34 = vmax.f32 %v484_v29, %v486_v31 }
 0x135   : > { %492 = vmax.xlane.f32.xlu0 %v491_v34 }
 0x1c2   : > { %v493_v38 = vpop.xlane.xlu0 %492 }
 0x1c3   : > { %v494_v39 = vmax.f32 %v490_v37, %v493_v38 }
 0x1c5   : > { %v495_v40 = vsub.f32 %v490_v37, %v494_v39  ;;  %584 = vst.msk [vmem:[#allocation2] sm:$0xff] %vm277_vm1, %v494_v39  ;;  %500 = vperm.xlu0 %860, %v494_v39  }
 0x1c7   : > { %v496_v51 = vmul.f32 1.442695, %v495_v40 }
 0x1c9   : > { %610 = vbcast.lane.b32.xlu0 %v749_v59, 256 }
 0x244   : > { %v501_v41 = vpop.permute.xlu0 %500 }
 0x245   : > { %v503_v42 = vsub.f32 %v484_v29, %v501_v41  ;;  %v504_v43 = vsub.f32 %v486_v31, %v501_v41 }
 0x247   : > { %v505_v44 = vmul.f32 1.442695, %v503_v42  ;;  %v507_v45 = vmul.f32 1.442695, %v504_v43 }
 0x248   : > { %v611_v11 = vpop.permute.xlu0 %610 }
 0x249   : > { %878 = vpow2.f32 %v505_v44 }
 0x24a   : > { %880 = vpow2.f32 %v507_v45 }
 0x24b   : > { %882 = vpow2.f32 %v496_v51 }
 0x253   : > { %v879_v46 = vpop.eup %878 }
 0x254   : > { %v881_v47 = vpop.eup %880  ;;  %v524_v48 = vpack.c.bf16 %v879_v46, %v879_v46 }
 0x255   : > { %v525_v49 = vpack.c.bf16 %v881_v47, %v881_v47  ;;  %v511_v50 = vadd.f32 %v881_v47, %v879_v46  ;;  %v883_v52 = vpop.eup %882 }
 0x256   : > { %v510_v54 = vmul.f32 %v883_v52, %v509_v53 }
 0x257   : > { %574 = vmatprep.mubr.bf16.mxu1 %v525_v49  ;;  %512 = vadd.xlane.f32.xlu1 %v511_v50 }
 0x258   : > { %575 = vmatmul.mubr.bf16.vlgmr.msra.gmra.mrb[0].mxu1 %v524_v48 }
 0x268   : > { %520 = vperm.xlu1 %861, %v883_v52  }
 0x2e4   : > { %v513_v55 = vpop.xlane.xlu1 %512 }
 0x2e5   : > { %v514_v56 = vadd.f32 %v513_v55, %v510_v54 }
 0x2e7   : > { %516 = vst.msk [vmem:[#allocation3] sm:$0xff] %vm277_vm1, %v514_v56 }
 0x2e8   : > { %v521_v61 = vpop.permute.xlu1 %520 }
 0x2e9   : > { %v523_v0 = vmul.f32 %v521_v61, %v517_v60 }
 0x2ee   : > { %v589_v57 = vld [vmem:[#allocation3] sm:$0xff] }
 0x2ef   : > { %884 = vrcp.f32 %v589_v57 }
 0x2f9   : > { %v885_v58 = vpop.eup %884 }
 0x2fa   : > { %594 = vperm.xlu1 %861, %v885_v58  }
 0x32b   : > { %v788_v62 = vpop.f32.mrb[0].mxu1 }
 0x32c   : > { %v789_v63 = vpop.f32.mrb[1].mxu1 }
 0x32d   : > { %v790_v1 = vadd.f32 %v789_v63, %v788_v62  ;;  %v791_v2 = vpop.f32.mrb[2].mxu1 }
 0x32e   : > { %v792_v3 = vpop.f32.mrb[3].mxu1 }
 0x32f   : > { %v582_v4 = vadd.f32 %v790_v1, %v523_v0 }
 0x331   : > { %583 = vst.msk [vmem:[#allocation4] sm:$0xff] %vm280_vm0, %v582_v4 }
 0x338   : > { %v588_v5 = vld [vmem:[#allocation4] sm:$0xff] }
 0x379   : > { %v595_v6 = vpop.permute.xlu1 %594 }
 0x37a   : > { %v597_v8 = vmul.f32 %v595_v6, %v588_v5 }
 0x37c   : > { %v599_v9 = vmul.f32 %v598_v7, %v597_v8 }
 0x37e   : > { %v600_v10 = vsel %vm280_vm0, %v599_v9, 0.0 }
 0x37f   : > { %601 = vadd.xlane.f32.xlu1 %v600_v10 }
 0x40c   : > { %v602_v12 = vpop.xlane.xlu1 %601 }
 0x40d   : > { %v613_v13 = vadd.f32 %v611_v11, %v602_v12 }
 0x40f   : > { %616 = vperm.xlu0 %860, %v613_v13  }
 0x48e   : > { %v617_v18 = vpop.permute.xlu0 %616 }
 0x48f   : > { %v623_v19 = vrot.slane %v617_v18, %v622_v17 }
 0x491   : > { %626 = vst.msk [vmem:[%s255_s9] sm:$0x1] %vm625_vm2, %v623_v19 }
 0x492   : > { %899 = shalt.err (!%p896_p5)
}
 0x493   : > { %s900_s24 = scalar_lea.hbm %s1123_s13, 16  ;;  %s904_s29 = scalar_lea.hbm %s1175_s5, 32 }
 0x494   : > { %p901_p6 = scmp.ne.s32.totalorder %s1123_s13, %s900_s24  ;;  %p905_p10 = scmp.lt.u32.totalorder %s1123_s13, %s1175_s5 }
 0x495   : > { %p906_p11 = scmp.lt.u32.totalorder %s904_s29, %s900_s24  ;;  %p908_p13 = scmp.lt.u32.totalorder %s900_s24, %s1123_s13 }
 0x496   : > { %p902_p7 = pnand %p901_p6, %p1040_p4 }
 0x497   : > { %p907_p12 = por %p906_p11, %p905_p10 }
 0x498   : > { %p903_p9 = pneg %p902_p7 }
 0x499   : > { %p909_p0 = por %p908_p13, %p907_p12 }
 0x49b   : > { %p910_p1 = pnand %p909_p0, %p903_p9 }
 0x49d   : > { %913 = shalt.err (!%p910_p1)
}
 0x49e   : > { %802 = dma.vmem_to_hbm [thread:$0]  (%p1040_p4), %s1125_s10, 16, %s1123_s13, %s628_s14  }
 0x49f PF: > { %p808_p2 = scmp.ge.s32.totalorder %s964_s23, 2  ;;  %s652_s9 = sand.u32 1, %s944_s18  }
 0x4a0   : > { %s653_s11 = scalar_lea.sflag [#allocation6], %s652_s9 }
 0x4a1   : > { %p805_p3 = pnand %p808_p2, %p1047_p8 }
 0x4a3   : > { %939 = dma.done.wait (!%p805_p3), %s653_s11, 16  }
 0x4a4   : > { %941 = vsyncadd (!%p805_p3), %s653_s11, 4294967280  ;;  %s18_s23 = sadd.s32 1, %s964_s23   ;;  %s1178_s18 = smov %s948_s19 }
 0x4a5   : > { %p15_p5 = scmp.ge.s32.totalorder %s18_s23, 4   ;;  %s1179_s19 = smov %s952_s20 }
 0x4a6   : > { %s1180_s20 = smov %s1053_s6  ;;  %s1181_s21 = smov %s960_s22 }
 0x4a7   : > { %s1182_s22 = smov %s1184_s26  ;;  %17 = sbr.rel (!%p15_p5) target bundleno = 4 (0x4), region = 86 }
 0x4ae   :  { %657 = vsyncpa [#allocation6], 1 }
 0x4af   :  { %659 = vsyncpa [#allocation6 + $0x1], 1 }

</bundles_post_ra>
